<compile_context>
chip_gen: v7x
topology: tpu7x:2x2x1
jax: 0.10.0
libtpu: 0.0.40
codegen_flags: <defaults>
</compile_context>

<pallas_src>
import functools

import jax
import jax.numpy as jnp
from jax import lax
from jax.experimental import pallas as pl
from jax.experimental.pallas import tpu as pltpu

_LANES = 128
_SUBLANES = 8
_PAD_ELEMS = 32 * _LANES            # one (32,128) tile: covers 1/2/4-byte dtypes
_DEFAULT_BLOCK_ROWS = 4096          # DMA block: (4096,128) f32 = 2 MiB/input/buffer
_DEFAULT_CHUNK_ROWS = 512           # compute chunk: keeps elementwise temps small
_NUM_SPLITS = 2                     # leading "parallel" axis (2 TensorCores on v7x)
_VMEM_LIMIT_BYTES = 32 * 1024 * 1024


def _combined_loss_kernel(x_ref, t_ref, acc_ref, *, n_valid, n_full_blocks,
                          block_rows, chunk_rows, blocks_per_split, needs_mask):
    """Accumulate per-block partial sums [bce, focal, p*t, p, t] into (1,5,8,128)."""
    c = pl.program_id(0)              # parallel split (one per TensorCore on v7x)
    i = pl.program_id(1)              # sequential reduction step within the split

    @pl.when(i == 0)
    def _init():
        acc_ref[...] = jnp.zeros_like(acc_ref)

    block_id = c * blocks_per_split + i
    n_chunks = block_rows // chunk_rows

    def fold(y):
        # (chunk_rows,128) -> (8,128): pure-VPU vreg adds; the cross-lane reduction
        # to scalars happens once, in the tiny JAX finalize.
        return jnp.sum(y.reshape(chunk_rows // _SUBLANES, _SUBLANES, _LANES), axis=0)

    def accumulate_chunk(ci, masked):
        if n_chunks == 1:
            x = x_ref[...]
            t = t_ref[...]
        else:
            r0 = pl.multiple_of(ci * chunk_rows, chunk_rows)
            x = x_ref[pl.ds(r0, chunk_rows), :]
            t = t_ref[pl.ds(r0, chunk_rows), :]
        x = x.astype(jnp.float32)     # logits
        t = t.astype(jnp.float32)     # targets

        if masked:
            # Mask by flat element index BEFORE any arithmetic so padded lanes and
            # unspecified partial-/phantom-block contents can never poison sums.
            base = block_id * (block_rows * _LANES) + ci * (chunk_rows * _LANES)
            ridx = lax.broadcasted_iota(jnp.int32, (chunk_rows, _LANES), 0)
            lidx = lax.broadcasted_iota(jnp.int32, (chunk_rows, _LANES), 1)
            valid = (base + ridx * _LANES + lidx) < n_valid
            x = jnp.where(valid, x, 0.0)
            t = jnp.where(valid, t, 0.0)

        # Numerically stable BCE-with-logits + sigmoid sharing one exp.
        e = jnp.exp(-jnp.abs(x))                      # in (0, 1]
        d = 1.0 + e
        r = pl.reciprocal(d, approx=True)             # EUP slot (VALU has no slack)
        r = r * (2.0 - d * r)                         # one Newton step -> ~f32 exact
        p = jnp.where(x >= 0.0, r, e * r)             # sigmoid(x)
        bce = jnp.maximum(x, 0.0) - x * t + jnp.log1p(e)

        if masked:
            mf = valid.astype(jnp.float32)
            bce = bce * mf                            # t already zeroed above
            p = p * mf

        tp = p * t                                    # soft intersection
        q = (t + p) - 2.0 * tp                        # == 1 - pt (soft targets too)
        focal = (0.25 * q * q) * bce                  # alpha=0.25, gamma=2

        acc_ref[0, 0, :, :] += fold(bce)
        acc_ref[0, 1, :, :] += fold(focal)
        acc_ref[0, 2, :, :] += fold(tp)
        acc_ref[0, 3, :, :] += fold(p)
        acc_ref[0, 4, :, :] += fold(t)

    def run_block(masked):
        if n_chunks == 1:
            accumulate_chunk(0, masked)
        else:
            def body(ci, carry):
                accumulate_chunk(ci, masked)
                return carry
            lax.fori_loop(0, n_chunks, body, 0)

    if needs_mask:
        # Only the (at most one) partial / phantom tail block pays the mask cost;
        # steady-state blocks run the unmasked path.
        is_full = block_id < n_full_blocks

        @pl.when(is_full)
        def _steady():
            run_block(masked=False)

        @pl.when(jnp.logical_not(is_full))
        def _tail():
            run_block(masked=True)
    else:
        run_block(masked=False)


_STREAM_DTYPES = (jnp.float32, jnp.bfloat16, jnp.float16, jnp.int8, jnp.uint8,
                  jnp.int32)


def _streamable(a):
    """Stream supported dtypes natively (the f32 cast happens in-kernel)."""
    if a.dtype == jnp.bool_:
        return a.astype(jnp.int8)          # 1 B/elem streamed instead of 4
    if any(a.dtype == d for d in _STREAM_DTYPES):
        return a
    return a.astype(jnp.float32)


def _pick_chunk_rows(block_rows, target):
    if block_rows <= max(target, 1024):
        return block_rows                   # small block: no inner chunking needed
    target = max(8, (target // 8) * 8)
    for cr in range(target, 7, -8):         # largest mult-of-8 divisor <= target
        if block_rows % cr == 0:
            return cr
    return block_rows


def combined_loss(outputs, targets, *, block_rows=_DEFAULT_BLOCK_ROWS,
                  chunk_rows=_DEFAULT_CHUNK_ROWS):
    """outputs/targets: arrays of identical shape (NCHW logits / binary targets)."""
    assert outputs.shape == targets.shape
    n = int(outputs.size)

    x = _streamable(outputs).reshape(-1)
    t = _streamable(targets).reshape(-1)

    # A real pad (copy) only happens when the element count is not a multiple of
    # one (32,128) tile — never for typical NCHW segmentation shapes.
    if n % _PAD_ELEMS != 0:
        pad = _PAD_ELEMS - n % _PAD_ELEMS
        x = jnp.pad(x, (0, pad))
        t = jnp.pad(t, (0, pad))
    rows = x.shape[0] // _LANES                  # multiple of 32
    x = x.reshape(rows, _LANES)
    t = t.reshape(rows, _LANES)

    block_rows = max(32, (block_rows // 32) * 32)
    br = min(block_rows, rows)                   # multiple of 32
    num_blocks = pl.cdiv(rows, br)
    splits = _NUM_SPLITS if num_blocks >= _NUM_SPLITS else 1
    bps = pl.cdiv(num_blocks, splits)            # robust v7x split (cdiv, not %)
    total_blocks = splits * bps                  # may include one phantom tail block
    chunk = _pick_chunk_rows(br, chunk_rows)

    needs_mask = (total_blocks * br * _LANES) != n
    n_full_blocks = n // (br * _LANES)           # blocks fully covered by valid data

    kernel = functools.partial(
        _combined_loss_kernel, n_valid=n, n_full_blocks=n_full_blocks,
        block_rows=br, chunk_rows=chunk, blocks_per_split=bps,
        needs_mask=needs_mask)

    if total_blocks > num_blocks:
        # Phantom tail block of the short split: clamp its DMA to the last real
        # block; its contents are masked to zero in-kernel.
        last = num_blocks - 1
        in_map = lambda c, i, last=last: (jnp.minimum(c * bps + i, last), 0)
    else:
        in_map = lambda c, i: (c * bps + i, 0)

    acc = pl.pallas_call(
        kernel,
        out_shape=jax.ShapeDtypeStruct((splits, 5, _SUBLANES, _LANES), jnp.float32),
        grid=(splits, bps),
        in_specs=[pl.BlockSpec((br, _LANES), in_map),
                  pl.BlockSpec((br, _LANES), in_map)],
        out_specs=pl.BlockSpec((1, 5, _SUBLANES, _LANES), lambda c, i: (c, 0, 0, 0)),
        compiler_params=pltpu.CompilerParams(
            dimension_semantics=("parallel", "arbitrary"),
            vmem_limit_bytes=_VMEM_LIMIT_BYTES),
    )(x, t)

    # Tiny finalize on 5 scalars (dice / tversky / weighting) in plain JAX.
    sums = jnp.sum(acc, axis=(0, 2, 3))
    sum_bce, sum_foc, inter, sum_p, sum_t = (sums[k] for k in range(5))
    n_f = jnp.float32(n)                         # static element count (exact)
    eps = 1e-7
    has_pos = (sum_t > 0.0).astype(jnp.float32)  # smp zeroes classes absent from GT

    # smp DiceLoss(mode='binary', from_logits=True, smooth=0, eps=1e-7)
    dice_loss = (1.0 - 2.0 * inter / jnp.maximum(sum_p + sum_t, eps)) * has_pos
    # smp TverskyLoss(mode='binary', alpha=0.7, beta=0.5 (smp default), gamma=1)
    fp = sum_p - inter
    fn = sum_t - inter
    tversky_loss = (1.0 - inter / jnp.maximum(inter + 0.7 * fp + 0.5 * fn, eps)) * has_pos

    return sum_bce / n_f + dice_loss + 0.5 * (sum_foc / n_f) + 0.5 * tversky_loss


def _reference_loss(x, t):
    # pure-JAX reference mirroring the PyTorch/smp semantics, for sanity checking
    x = x.astype(jnp.float32)
    t = t.astype(jnp.float32)
    bce = jnp.maximum(x, 0.0) - x * t + jnp.log1p(jnp.exp(-jnp.abs(x)))
    p = jax.nn.sigmoid(x)
    pt = t * p + (1.0 - t) * (1.0 - p)
    focal = jnp.mean(0.25 * (1.0 - pt) ** 2 * bce)
    bce_m = jnp.mean(bce)
    inter, sum_p, sum_t = jnp.sum(p * t), jnp.sum(p), jnp.sum(t)
    eps = 1e-7
    has_pos = (sum_t > 0).astype(jnp.float32)
    dice = (1.0 - (2.0 * inter) / jnp.maximum(sum_p + sum_t, eps)) * has_pos
    tver = (1.0 - inter / jnp.maximum(inter + 0.7 * (sum_p - inter) + 0.5 * (sum_t - inter), eps)) * has_pos
    return bce_m + dice + 0.5 * focal + 0.5 * tver


if __name__ == "__main__":
    key = jax.random.PRNGKey(0)
    k1, k2, k3, k4, k5, k6 = jax.random.split(key, 6)

    # small binary-segmentation shaped inputs (NCHW, C=1) — single masked block
    B, C, H, W = 2, 1, 16, 16
    out_s = jax.random.normal(k1, (B, C, H, W), dtype=jnp.float32)
    tgt_s = (jax.random.uniform(k2, (B, C, H, W)) < 0.5).astype(jnp.float32)
    loss_s = combined_loss(out_s, tgt_s)
    jax.block_until_ready(loss_s)
    ref_s = _reference_loss(out_s, tgt_s)
    assert abs(float(loss_s) - float(ref_s)) < 1e-4, (float(loss_s), float(ref_s))

    # larger case — multi-block accumulation, inner chunk loop, 2-way core split,
    # fully unmasked steady state
    B, C, H, W = 1, 1, 1024, 1024
    out_l = jax.random.normal(k3, (B, C, H, W), dtype=jnp.float32)
    tgt_l = (jax.random.uniform(k4, (B, C, H, W)) < 0.5).astype(jnp.float32)
    loss_l = combined_loss(out_l, tgt_l)
    jax.block_until_ready(loss_l)
    ref_l = _reference_loss(out_l, tgt_l)
    assert abs(float(loss_l) - float(ref_l)) < 1e-3, (float(loss_l), float(ref_l))

    # odd block count + native bf16 streaming — exercises the cdiv split, the
    # clamped phantom block, and the pl.when-gated partial tail block
    B, C, H, W = 3, 1, 640, 640
    out_o = jax.random.normal(k5, (B, C, H, W), dtype=jnp.float32).astype(jnp.bfloat16)
    tgt_o = (jax.random.uniform(k6, (B, C, H, W)) < 0.5).astype(jnp.bfloat16)
    loss_o = combined_loss(out_o, tgt_o)
    jax.block_until_ready(loss_o)
    ref_o = _reference_loss(out_o, tgt_o)
    assert abs(float(loss_o) - float(ref_o)) < 1e-3, (float(loss_o), float(ref_o))

    print("KERNEL_OK")
</pallas_src>

<mosaic_0001>
module attributes {stable_mosaic.version = 11 : i64} {
  func.func @_combined_loss_kernel(%arg0: i32, %arg1: i32, %arg2: memref<32x128xf32, #tpu.memory_space<vmem>>, %arg3: memref<32x128xf32, #tpu.memory_space<vmem>>, %arg4: memref<1x5x8x128xf32, #tpu.memory_space<vmem>>) attributes {dimension_semantics = [#tpu.dimension_semantics<parallel>, #tpu.dimension_semantics<arbitrary>], iteration_bounds = array<i64: 1, 1>, scalar_prefetch = 0 : i64, scratch_operands = 0 : i64, tpu.core_type = #tpu.core_type<tc>, window_params = [{transform_indices = @transform_0, window_bounds = array<i64: 32, 128>}, {transform_indices = @transform_1, window_bounds = array<i64: 32, 128>}, {transform_indices = @transform_2, window_bounds = array<i64: 1, 5, 8, 128>}]} {
    %c0_i32 = arith.constant 0 : i32
    %0 = arith.cmpi eq, %arg1, %c0_i32 : i32
    %1 = arith.extui %0 : i1 to i32
    %c0_i32_0 = arith.constant 0 : i32
    %2 = arith.cmpi ne, %1, %c0_i32_0 : i32
    scf.if %2 {
      %cst = arith.constant 0.000000e+00 : f32
      %11 = vector.broadcast %cst : f32 to vector<1x5x8x128xf32>
      %c0 = arith.constant 0 : index
      %c0_4 = arith.constant 0 : index
      %c0_5 = arith.constant 0 : index
      %c0_6 = arith.constant 0 : index
      %12 = vector.load %arg4[%c0, %c0_4, %c0_5, %c0_6] : memref<1x5x8x128xf32, #tpu.memory_space<vmem>>, vector<1x5x8x128xf32>
      tpu.vector_store %arg4[%c0, %c0_4, %c0_5, %c0_6], %11 {strides = array<i32>} : memref<1x5x8x128xf32, #tpu.memory_space<vmem>>, vector<1x5x8x128xf32>,
    } else {
    }
    %c1_i32 = arith.constant 1 : i32
    %3 = arith.muli %arg0, %c1_i32 : i32
    %4 = arith.addi %3, %arg1 : i32
    %c0_i32_1 = arith.constant 0 : i32
    %5 = arith.cmpi slt, %4, %c0_i32_1 : i32
    %6 = arith.extui %5 : i1 to i32
    %c0_i32_2 = arith.constant 0 : i32
    %7 = arith.cmpi ne, %6, %c0_i32_2 : i32
    scf.if %7 {
      %c0 = arith.constant 0 : index
      %c0_4 = arith.constant 0 : index
      %11 = vector.load %arg2[%c0, %c0_4] : memref<32x128xf32, #tpu.memory_space<vmem>>, vector<32x128xf32>
      %c0_5 = arith.constant 0 : index
      %c0_6 = arith.constant 0 : index
      %12 = vector.load %arg3[%c0_5, %c0_6] : memref<32x128xf32, #tpu.memory_space<vmem>>, vector<32x128xf32>
      %13 = math.absf %11 : vector<32x128xf32>
      %cst = arith.constant 0.000000e+00 : f32
      %14 = vector.broadcast %cst : f32 to vector<32x128xf32>
      %15 = arith.subf %14, %13 : vector<32x128xf32>
      %16 = math.exp %15 : vector<32x128xf32>
      %cst_7 = arith.constant 1.000000e+00 : f32
      %17 = vector.broadcast %cst_7 : f32 to vector<32x128xf32>
      %18 = arith.addf %17, %16 : vector<32x128xf32>
      %19 = tpu.reciprocal %18 {approx = true} : vector<32x128xf32> -> vector<32x128xf32>
      %20 = arith.mulf %18, %19 : vector<32x128xf32>
      %cst_8 = arith.constant 2.000000e+00 : f32
      %21 = vector.broadcast %cst_8 : f32 to vector<32x128xf32>
      %22 = arith.subf %21, %20 : vector<32x128xf32>
      %23 = arith.mulf %19, %22 : vector<32x128xf32>
      %cst_9 = arith.constant 0.000000e+00 : f32
      %24 = vector.broadcast %cst_9 : f32 to vector<32x128xf32>
      %25 = arith.cmpf oge, %11, %24 : vector<32x128xf32>
      %26 = arith.mulf %16, %23 : vector<32x128xf32>
      %27 = arith.select %25, %23, %26 : vector<32x128xi1>, vector<32x128xf32>
      %cst_10 = arith.constant 0.000000e+00 : f32
      %28 = vector.broadcast %cst_10 : f32 to vector<32x128xf32>
      %29 = arith.maximumf %11, %28 : vector<32x128xf32>
      %30 = arith.mulf %11, %12 : vector<32x128xf32>
      %31 = arith.subf %29, %30 : vector<32x128xf32>
      %32 = math.log1p %16 : vector<32x128xf32>
      %33 = arith.addf %31, %32 : vector<32x128xf32>
      %34 = arith.mulf %27, %12 : vector<32x128xf32>
      %35 = arith.addf %12, %27 : vector<32x128xf32>
      %cst_11 = arith.constant 2.000000e+00 : f32
      %36 = vector.broadcast %cst_11 : f32 to vector<32x128xf32>
      %37 = arith.mulf %36, %34 : vector<32x128xf32>
      %38 = arith.subf %35, %37 : vector<32x128xf32>
      %cst_12 = arith.constant 2.500000e-01 : f32
      %39 = vector.broadcast %cst_12 : f32 to vector<32x128xf32>
      %40 = arith.mulf %39, %38 : vector<32x128xf32>
      %41 = arith.mulf %40, %38 : vector<32x128xf32>
      %42 = arith.mulf %41, %33 : vector<32x128xf32>
      %c0_13 = arith.constant 0 : index
      %c0_14 = arith.constant 0 : index
      %c0_15 = arith.constant 0 : index
      %c0_16 = arith.constant 0 : index
      %43 = vector.load %arg4[%c0_13, %c0_14, %c0_15, %c0_16] : memref<1x5x8x128xf32, #tpu.memory_space<vmem>>, vector<1x1x8x128xf32>
      %44 = vector.shape_cast %43 : vector<1x1x8x128xf32> to vector<8x128xf32>
      %45 = vector.shape_cast %33 : vector<32x128xf32> to vector<4x8x128xf32>
      %cst_17 = arith.constant dense<0.000000e+00> : vector<8x128xf32>
      %46 = vector.multi_reduction <add>, %45, %cst_17 [0] : vector<4x8x128xf32> to vector<8x128xf32>
      %47 = arith.addf %44, %46 : vector<8x128xf32>
      %c0_18 = arith.constant 0 : index
      %c0_19 = arith.constant 0 : index
      %c0_20 = arith.constant 0 : index
      %c0_21 = arith.constant 0 : index
      %48 = vector.load %arg4[%c0_18, %c0_19, %c0_20, %c0_21] : memref<1x5x8x128xf32, #tpu.memory_space<vmem>>, vector<1x1x8x128xf32>
      %49 = vector.shape_cast %48 : vector<1x1x8x128xf32> to vector<8x128xf32>
      %50 = vector.shape_cast %47 : vector<8x128xf32> to vector<1x1x8x128xf32>
      tpu.vector_store %arg4[%c0_18, %c0_19, %c0_20, %c0_21], %50 {strides = array<i32>} : memref<1x5x8x128xf32, #tpu.memory_space<vmem>>, vector<1x1x8x128xf32>,
      %c0_22 = arith.constant 0 : index
      %c1 = arith.constant 1 : index
      %c0_23 = arith.constant 0 : index
      %c0_24 = arith.constant 0 : index
      %51 = vector.load %arg4[%c0_22, %c1, %c0_23, %c0_24] : memref<1x5x8x128xf32, #tpu.memory_space<vmem>>, vector<1x1x8x128xf32>
      %52 = vector.shape_cast %51 : vector<1x1x8x128xf32> to vector<8x128xf32>
      %53 = vector.shape_cast %42 : vector<32x128xf32> to vector<4x8x128xf32>
      %cst_25 = arith.constant dense<0.000000e+00> : vector<8x128xf32>
      %54 = vector.multi_reduction <add>, %53, %cst_25 [0] : vector<4x8x128xf32> to vector<8x128xf32>
      %55 = arith.addf %52, %54 : vector<8x128xf32>
      %c0_26 = arith.constant 0 : index
      %c1_27 = arith.constant 1 : index
      %c0_28 = arith.constant 0 : index
      %c0_29 = arith.constant 0 : index
      %56 = vector.load %arg4[%c0_26, %c1_27, %c0_28, %c0_29] : memref<1x5x8x128xf32, #tpu.memory_space<vmem>>, vector<1x1x8x128xf32>
      %57 = vector.shape_cast %56 : vector<1x1x8x128xf32> to vector<8x128xf32>
      %58 = vector.shape_cast %55 : vector<8x128xf32> to vector<1x1x8x128xf32>
      tpu.vector_store %arg4[%c0_26, %c1_27, %c0_28, %c0_29], %58 {strides = array<i32>} : memref<1x5x8x128xf32, #tpu.memory_space<vmem>>, vector<1x1x8x128xf32>,
      %c0_30 = arith.constant 0 : index
      %c2 = arith.constant 2 : index
      %c0_31 = arith.constant 0 : index
      %c0_32 = arith.constant 0 : index
      %59 = vector.load %arg4[%c0_30, %c2, %c0_31, %c0_32] : memref<1x5x8x128xf32, #tpu.memory_space<vmem>>, vector<1x1x8x128xf32>
      %60 = vector.shape_cast %59 : vector<1x1x8x128xf32> to vector<8x128xf32>
      %61 = vector.shape_cast %34 : vector<32x128xf32> to vector<4x8x128xf32>
      %cst_33 = arith.constant dense<0.000000e+00> : vector<8x128xf32>
      %62 = vector.multi_reduction <add>, %61, %cst_33 [0] : vector<4x8x128xf32> to vector<8x128xf32>
      %63 = arith.addf %60, %62 : vector<8x128xf32>
      %c0_34 = arith.constant 0 : index
      %c2_35 = arith.constant 2 : index
      %c0_36 = arith.constant 0 : index
      %c0_37 = arith.constant 0 : index
      %64 = vector.load %arg4[%c0_34, %c2_35, %c0_36, %c0_37] : memref<1x5x8x128xf32, #tpu.memory_space<vmem>>, vector<1x1x8x128xf32>
      %65 = vector.shape_cast %64 : vector<1x1x8x128xf32> to vector<8x128xf32>
      %66 = vector.shape_cast %63 : vector<8x128xf32> to vector<1x1x8x128xf32>
      tpu.vector_store %arg4[%c0_34, %c2_35, %c0_36, %c0_37], %66 {strides = array<i32>} : memref<1x5x8x128xf32, #tpu.memory_space<vmem>>, vector<1x1x8x128xf32>,
      %c0_38 = arith.constant 0 : index
      %c3 = arith.constant 3 : index
      %c0_39 = arith.constant 0 : index
      %c0_40 = arith.constant 0 : index
      %67 = vector.load %arg4[%c0_38, %c3, %c0_39, %c0_40] : memref<1x5x8x128xf32, #tpu.memory_space<vmem>>, vector<1x1x8x128xf32>
      %68 = vector.shape_cast %67 : vector<1x1x8x128xf32> to vector<8x128xf32>
      %69 = vector.shape_cast %27 : vector<32x128xf32> to vector<4x8x128xf32>
      %cst_41 = arith.constant dense<0.000000e+00> : vector<8x128xf32>
      %70 = vector.multi_reduction <add>, %69, %cst_41 [0] : vector<4x8x128xf32> to vector<8x128xf32>
      %71 = arith.addf %68, %70 : vector<8x128xf32>
      %c0_42 = arith.constant 0 : index
      %c3_43 = arith.constant 3 : index
      %c0_44 = arith.constant 0 : index
      %c0_45 = arith.constant 0 : index
      %72 = vector.load %arg4[%c0_42, %c3_43, %c0_44, %c0_45] : memref<1x5x8x128xf32, #tpu.memory_space<vmem>>, vector<1x1x8x128xf32>
      %73 = vector.shape_cast %72 : vector<1x1x8x128xf32> to vector<8x128xf32>
      %74 = vector.shape_cast %71 : vector<8x128xf32> to vector<1x1x8x128xf32>
      tpu.vector_store %arg4[%c0_42, %c3_43, %c0_44, %c0_45], %74 {strides = array<i32>} : memref<1x5x8x128xf32, #tpu.memory_space<vmem>>, vector<1x1x8x128xf32>,
      %c0_46 = arith.constant 0 : index
      %c4 = arith.constant 4 : index
      %c0_47 = arith.constant 0 : index
      %c0_48 = arith.constant 0 : index
      %75 = vector.load %arg4[%c0_46, %c4, %c0_47, %c0_48] : memref<1x5x8x128xf32, #tpu.memory_space<vmem>>, vector<1x1x8x128xf32>
      %76 = vector.shape_cast %75 : vector<1x1x8x128xf32> to vector<8x128xf32>
      %77 = vector.shape_cast %12 : vector<32x128xf32> to vector<4x8x128xf32>
      %cst_49 = arith.constant dense<0.000000e+00> : vector<8x128xf32>
      %78 = vector.multi_reduction <add>, %77, %cst_49 [0] : vector<4x8x128xf32> to vector<8x128xf32>
      %79 = arith.addf %76, %78 : vector<8x128xf32>
      %c0_50 = arith.constant 0 : index
      %c4_51 = arith.constant 4 : index
      %c0_52 = arith.constant 0 : index
      %c0_53 = arith.constant 0 : index
      %80 = vector.load %arg4[%c0_50, %c4_51, %c0_52, %c0_53] : memref<1x5x8x128xf32, #tpu.memory_space<vmem>>, vector<1x1x8x128xf32>
      %81 = vector.shape_cast %80 : vector<1x1x8x128xf32> to vector<8x128xf32>
      %82 = vector.shape_cast %79 : vector<8x128xf32> to vector<1x1x8x128xf32>
      tpu.vector_store %arg4[%c0_50, %c4_51, %c0_52, %c0_53], %82 {strides = array<i32>} : memref<1x5x8x128xf32, #tpu.memory_space<vmem>>, vector<1x1x8x128xf32>,
    } else {
    }
    %true = arith.constant true
    %8 = arith.xori %5, %true : i1
    %9 = arith.extui %8 : i1 to i32
    %c0_i32_3 = arith.constant 0 : i32
    %10 = arith.cmpi ne, %9, %c0_i32_3 : i32
    scf.if %10 {
      %c0 = arith.constant 0 : index
      %c0_4 = arith.constant 0 : index
      %11 = vector.load %arg2[%c0, %c0_4] : memref<32x128xf32, #tpu.memory_space<vmem>>, vector<32x128xf32>
      %c0_5 = arith.constant 0 : index
      %c0_6 = arith.constant 0 : index
      %12 = vector.load %arg3[%c0_5, %c0_6] : memref<32x128xf32, #tpu.memory_space<vmem>>, vector<32x128xf32>
      %c4096_i32 = arith.constant 4096 : i32
      %13 = arith.muli %4, %c4096_i32 : i32
      %c0_i32_7 = arith.constant 0 : i32
      %14 = arith.addi %13, %c0_i32_7 : i32
      %15 = tpu.iota {dimensions = array<i32: 0>} : vector<32x128xi32>
      %16 = tpu.iota {dimensions = array<i32: 1>} : vector<32x128xi32>
      %c128_i32 = arith.constant 128 : i32
      %17 = vector.broadcast %c128_i32 : i32 to vector<32x128xi32>
      %18 = arith.muli %15, %17 : vector<32x128xi32>
      %19 = vector.broadcast %14 : i32 to vector<32x128xi32>
      %20 = arith.addi %19, %18 : vector<32x128xi32>
      %21 = arith.addi %20, %16 : vector<32x128xi32>
      %c512_i32 = arith.constant 512 : i32
      %22 = vector.broadcast %c512_i32 : i32 to vector<32x128xi32>
      %23 = arith.cmpi slt, %21, %22 : vector<32x128xi32>
      %cst = arith.constant 0.000000e+00 : f32
      %24 = vector.broadcast %cst : f32 to vector<32x128xf32>
      %25 = arith.select %23, %11, %24 : vector<32x128xi1>, vector<32x128xf32>
      %cst_8 = arith.constant 0.000000e+00 : f32
      %26 = vector.broadcast %cst_8 : f32 to vector<32x128xf32>
      %27 = arith.select %23, %12, %26 : vector<32x128xi1>, vector<32x128xf32>
      %28 = math.absf %25 : vector<32x128xf32>
      %cst_9 = arith.constant 0.000000e+00 : f32
      %29 = vector.broadcast %cst_9 : f32 to vector<32x128xf32>
      %30 = arith.subf %29, %28 : vector<32x128xf32>
      %31 = math.exp %30 : vector<32x128xf32>
      %cst_10 = arith.constant 1.000000e+00 : f32
      %32 = vector.broadcast %cst_10 : f32 to vector<32x128xf32>
      %33 = arith.addf %32, %31 : vector<32x128xf32>
      %34 = tpu.reciprocal %33 {approx = true} : vector<32x128xf32> -> vector<32x128xf32>
      %35 = arith.mulf %33, %34 : vector<32x128xf32>
      %cst_11 = arith.constant 2.000000e+00 : f32
      %36 = vector.broadcast %cst_11 : f32 to vector<32x128xf32>
      %37 = arith.subf %36, %35 : vector<32x128xf32>
      %38 = arith.mulf %34, %37 : vector<32x128xf32>
      %cst_12 = arith.constant 0.000000e+00 : f32
      %39 = vector.broadcast %cst_12 : f32 to vector<32x128xf32>
      %40 = arith.cmpf oge, %25, %39 : vector<32x128xf32>
      %41 = arith.mulf %31, %38 : vector<32x128xf32>
      %42 = arith.select %40, %38, %41 : vector<32x128xi1>, vector<32x128xf32>
      %cst_13 = arith.constant 0.000000e+00 : f32
      %43 = vector.broadcast %cst_13 : f32 to vector<32x128xf32>
      %44 = arith.maximumf %25, %43 : vector<32x128xf32>
      %45 = arith.mulf %25, %27 : vector<32x128xf32>
      %46 = arith.subf %44, %45 : vector<32x128xf32>
      %47 = math.log1p %31 : vector<32x128xf32>
      %48 = arith.addf %46, %47 : vector<32x128xf32>
      %49 = arith.extui %23 : vector<32x128xi1> to vector<32x128xi32>
      %50 = arith.sitofp %49 : vector<32x128xi32> to vector<32x128xf32>
      %51 = arith.mulf %48, %50 : vector<32x128xf32>
      %52 = arith.mulf %42, %50 : vector<32x128xf32>
      %53 = arith.mulf %52, %27 : vector<32x128xf32>
      %54 = arith.addf %27, %52 : vector<32x128xf32>
      %cst_14 = arith.constant 2.000000e+00 : f32
      %55 = vector.broadcast %cst_14 : f32 to vector<32x128xf32>
      %56 = arith.mulf %55, %53 : vector<32x128xf32>
      %57 = arith.subf %54, %56 : vector<32x128xf32>
      %cst_15 = arith.constant 2.500000e-01 : f32
      %58 = vector.broadcast %cst_15 : f32 to vector<32x128xf32>
      %59 = arith.mulf %58, %57 : vector<32x128xf32>
      %60 = arith.mulf %59, %57 : vector<32x128xf32>
      %61 = arith.mulf %60, %51 : vector<32x128xf32>
      %c0_16 = arith.constant 0 : index
      %c0_17 = arith.constant 0 : index
      %c0_18 = arith.constant 0 : index
      %c0_19 = arith.constant 0 : index
      %62 = vector.load %arg4[%c0_16, %c0_17, %c0_18, %c0_19] : memref<1x5x8x128xf32, #tpu.memory_space<vmem>>, vector<1x1x8x128xf32>
      %63 = vector.shape_cast %62 : vector<1x1x8x128xf32> to vector<8x128xf32>
      %64 = vector.shape_cast %51 : vector<32x128xf32> to vector<4x8x128xf32>
      %cst_20 = arith.constant dense<0.000000e+00> : vector<8x128xf32>
      %65 = vector.multi_reduction <add>, %64, %cst_20 [0] : vector<4x8x128xf32> to vector<8x128xf32>
      %66 = arith.addf %63, %65 : vector<8x128xf32>
      %c0_21 = arith.constant 0 : index
      %c0_22 = arith.constant 0 : index
      %c0_23 = arith.constant 0 : index
      %c0_24 = arith.constant 0 : index
      %67 = vector.load %arg4[%c0_21, %c0_22, %c0_23, %c0_24] : memref<1x5x8x128xf32, #tpu.memory_space<vmem>>, vector<1x1x8x128xf32>
      %68 = vector.shape_cast %67 : vector<1x1x8x128xf32> to vector<8x128xf32>
      %69 = vector.shape_cast %66 : vector<8x128xf32> to vector<1x1x8x128xf32>
      tpu.vector_store %arg4[%c0_21, %c0_22, %c0_23, %c0_24], %69 {strides = array<i32>} : memref<1x5x8x128xf32, #tpu.memory_space<vmem>>, vector<1x1x8x128xf32>,
      %c0_25 = arith.constant 0 : index
      %c1 = arith.constant 1 : index
      %c0_26 = arith.constant 0 : index
      %c0_27 = arith.constant 0 : index
      %70 = vector.load %arg4[%c0_25, %c1, %c0_26, %c0_27] : memref<1x5x8x128xf32, #tpu.memory_space<vmem>>, vector<1x1x8x128xf32>
      %71 = vector.shape_cast %70 : vector<1x1x8x128xf32> to vector<8x128xf32>
      %72 = vector.shape_cast %61 : vector<32x128xf32> to vector<4x8x128xf32>
      %cst_28 = arith.constant dense<0.000000e+00> : vector<8x128xf32>
      %73 = vector.multi_reduction <add>, %72, %cst_28 [0] : vector<4x8x128xf32> to vector<8x128xf32>
      %74 = arith.addf %71, %73 : vector<8x128xf32>
      %c0_29 = arith.constant 0 : index
      %c1_30 = arith.constant 1 : index
      %c0_31 = arith.constant 0 : index
      %c0_32 = arith.constant 0 : index
      %75 = vector.load %arg4[%c0_29, %c1_30, %c0_31, %c0_32] : memref<1x5x8x128xf32, #tpu.memory_space<vmem>>, vector<1x1x8x128xf32>
      %76 = vector.shape_cast %75 : vector<1x1x8x128xf32> to vector<8x128xf32>
      %77 = vector.shape_cast %74 : vector<8x128xf32> to vector<1x1x8x128xf32>
      tpu.vector_store %arg4[%c0_29, %c1_30, %c0_31, %c0_32], %77 {strides = array<i32>} : memref<1x5x8x128xf32, #tpu.memory_space<vmem>>, vector<1x1x8x128xf32>,
      %c0_33 = arith.constant 0 : index
      %c2 = arith.constant 2 : index
      %c0_34 = arith.constant 0 : index
      %c0_35 = arith.constant 0 : index
      %78 = vector.load %arg4[%c0_33, %c2, %c0_34, %c0_35] : memref<1x5x8x128xf32, #tpu.memory_space<vmem>>, vector<1x1x8x128xf32>
      %79 = vector.shape_cast %78 : vector<1x1x8x128xf32> to vector<8x128xf32>
      %80 = vector.shape_cast %53 : vector<32x128xf32> to vector<4x8x128xf32>
      %cst_36 = arith.constant dense<0.000000e+00> : vector<8x128xf32>
      %81 = vector.multi_reduction <add>, %80, %cst_36 [0] : vector<4x8x128xf32> to vector<8x128xf32>
      %82 = arith.addf %79, %81 : vector<8x128xf32>
      %c0_37 = arith.constant 0 : index
      %c2_38 = arith.constant 2 : index
      %c0_39 = arith.constant 0 : index
      %c0_40 = arith.constant 0 : index
      %83 = vector.load %arg4[%c0_37, %c2_38, %c0_39, %c0_40] : memref<1x5x8x128xf32, #tpu.memory_space<vmem>>, vector<1x1x8x128xf32>
      %84 = vector.shape_cast %83 : vector<1x1x8x128xf32> to vector<8x128xf32>
      %85 = vector.shape_cast %82 : vector<8x128xf32> to vector<1x1x8x128xf32>
      tpu.vector_store %arg4[%c0_37, %c2_38, %c0_39, %c0_40], %85 {strides = array<i32>} : memref<1x5x8x128xf32, #tpu.memory_space<vmem>>, vector<1x1x8x128xf32>,
      %c0_41 = arith.constant 0 : index
      %c3 = arith.constant 3 : index
      %c0_42 = arith.constant 0 : index
      %c0_43 = arith.constant 0 : index
      %86 = vector.load %arg4[%c0_41, %c3, %c0_42, %c0_43] : memref<1x5x8x128xf32, #tpu.memory_space<vmem>>, vector<1x1x8x128xf32>
      %87 = vector.shape_cast %86 : vector<1x1x8x128xf32> to vector<8x128xf32>
      %88 = vector.shape_cast %52 : vector<32x128xf32> to vector<4x8x128xf32>
      %cst_44 = arith.constant dense<0.000000e+00> : vector<8x128xf32>
      %89 = vector.multi_reduction <add>, %88, %cst_44 [0] : vector<4x8x128xf32> to vector<8x128xf32>
      %90 = arith.addf %87, %89 : vector<8x128xf32>
      %c0_45 = arith.constant 0 : index
      %c3_46 = arith.constant 3 : index
      %c0_47 = arith.constant 0 : index
      %c0_48 = arith.constant 0 : index
      %91 = vector.load %arg4[%c0_45, %c3_46, %c0_47, %c0_48] : memref<1x5x8x128xf32, #tpu.memory_space<vmem>>, vector<1x1x8x128xf32>
      %92 = vector.shape_cast %91 : vector<1x1x8x128xf32> to vector<8x128xf32>
      %93 = vector.shape_cast %90 : vector<8x128xf32> to vector<1x1x8x128xf32>
      tpu.vector_store %arg4[%c0_45, %c3_46, %c0_47, %c0_48], %93 {strides = array<i32>} : memref<1x5x8x128xf32, #tpu.memory_space<vmem>>, vector<1x1x8x128xf32>,
      %c0_49 = arith.constant 0 : index
      %c4 = arith.constant 4 : index
      %c0_50 = arith.constant 0 : index
      %c0_51 = arith.constant 0 : index
      %94 = vector.load %arg4[%c0_49, %c4, %c0_50, %c0_51] : memref<1x5x8x128xf32, #tpu.memory_space<vmem>>, vector<1x1x8x128xf32>
      %95 = vector.shape_cast %94 : vector<1x1x8x128xf32> to vector<8x128xf32>
      %96 = vector.shape_cast %27 : vector<32x128xf32> to vector<4x8x128xf32>
      %cst_52 = arith.constant dense<0.000000e+00> : vector<8x128xf32>
      %97 = vector.multi_reduction <add>, %96, %cst_52 [0] : vector<4x8x128xf32> to vector<8x128xf32>
      %98 = arith.addf %95, %97 : vector<8x128xf32>
      %c0_53 = arith.constant 0 : index
      %c4_54 = arith.constant 4 : index
      %c0_55 = arith.constant 0 : index
      %c0_56 = arith.constant 0 : index
      %99 = vector.load %arg4[%c0_53, %c4_54, %c0_55, %c0_56] : memref<1x5x8x128xf32, #tpu.memory_space<vmem>>, vector<1x1x8x128xf32>
      %100 = vector.shape_cast %99 : vector<1x1x8x128xf32> to vector<8x128xf32>
      %101 = vector.shape_cast %98 : vector<8x128xf32> to vector<1x1x8x128xf32>
      tpu.vector_store %arg4[%c0_53, %c4_54, %c0_55, %c0_56], %101 {strides = array<i32>} : memref<1x5x8x128xf32, #tpu.memory_space<vmem>>, vector<1x1x8x128xf32>,
    } else {
    }
    return
  }
  func.func @transform_0(%arg0: i32, %arg1: i32) -> (i32, i32) {
    %c1_i32 = arith.constant 1 : i32
    %0 = arith.muli %arg0, %c1_i32 : i32
    %1 = arith.addi %0, %arg1 : i32
    %c0_i32 = arith.constant 0 : i32
    %c0_i32_0 = arith.constant 0 : i32
    return %1, %c0_i32 : i32, i32
  }
  func.func @transform_1(%arg0: i32, %arg1: i32) -> (i32, i32) {
    %c1_i32 = arith.constant 1 : i32
    %0 = arith.muli %arg0, %c1_i32 : i32
    %1 = arith.addi %0, %arg1 : i32
    %c0_i32 = arith.constant 0 : i32
    %c0_i32_0 = arith.constant 0 : i32
    return %1, %c0_i32 : i32, i32
  }
  func.func @transform_2(%arg0: i32, %arg1: i32) -> (i32, i32, i32, i32) {
    %c0_i32 = arith.constant 0 : i32
    %c0_i32_0 = arith.constant 0 : i32
    %c0_i32_1 = arith.constant 0 : i32
    %c0_i32_2 = arith.constant 0 : i32
    return %arg0, %c0_i32, %c0_i32_0, %c0_i32_1 : i32, i32, i32, i32
  }
}

</mosaic_0001>

<bundles_post_ra>
// kernel: tpu_custom_call.1
= control target key start
LH: loop header
LB: loop body
LE: loop exit
PB: predicated region body
PF: predicated region fallthrough
CT: control target
= control target key end

     0   :  { %7 = vsyncpa [#allocation3], 0  ;;  %s797_s0 = inlined_call_operand.hbm [shape: f32[32,128], index: 0, kind: input, shape index: {}]   ;;  %s798_s1 = inlined_call_operand.hbm [shape: f32[32,128], index: 1, kind: input, shape index: {}]   ;;  %s799_s2 = inlined_call_operand.hbm [shape: f32[1,5,8,128], index: 2, kind: output, shape index: {}]  }
   0x1   :  { %8 = vsyncpa [#allocation6], 0 }
   0x2   :  { %9 = vsyncpa [#allocation4], 0  ;;  %s583_s9 = smov [#allocation2]   ;;  %s511_s13 = scalar_lea.hbm %s797_s0, 512 }
   0x3   :  { %s19_s10 = sshll.u32 %s583_s9, 4  ;;  %p512_p0 = scmp.ne.s32.totalorder %s797_s0, %s511_s13  ;;  %s20_s10 = int_to_ptr.vmem [resolvable:$true] %s19_s10 }
   0x4   :  { %p515_p1 = scmp.lt.u32.totalorder %s511_s13, %s797_s0 }
   0x6   :  { %p517_p2 = pnand %p515_p1, %p512_p0 }
   0x8   :  { %520 = shalt.err (!%p517_p2)
}
   0x9   :  { %s521_s18 = scalar_lea.vmem %s20_s10, 512  ;;  %p526_p4 = scmp.lt.s32.totalorder %s20_s10, %s20_s10 }
   0xa   :  { %p522_p3 = scmp.ne.s32.totalorder %s20_s10, %s521_s18  ;;  %p527_p5 = scmp.lt.s32.totalorder %s521_s18, %s521_s18 }
   0xc   :  { %p528_p6 = por %p527_p5, %p526_p4 }
   0xe   :  { %p529_p7 = pnand %p528_p6, %p522_p3 }
  0x10   :  { %532 = shalt.err (!%p529_p7)
}
  0x11   :  { %s584_s19 = smov 128   ;;  %s585_s20 = smov 8  }
  0x12   :  { %25 = dma.hbm_to_vmem [thread:$0]  %s797_s0, 512, %s20_s10, [#allocation3], %s584_s19, %s584_s19, %s585_s20  }
  0x13   :  { %s586_s23 = smov [#allocation5]   ;;  %s533_s27 = scalar_lea.hbm %s798_s1, 512 }
  0x14   :  { %s35_s24 = sshll.u32 %s586_s23, 4  ;;  %p534_p8 = scmp.ne.s32.totalorder %s798_s1, %s533_s27  ;;  %s36_s24 = int_to_ptr.vmem [resolvable:$true] %s35_s24 }
  0x15   :  { %p537_p9 = scmp.lt.u32.totalorder %s533_s27, %s798_s1 }
  0x17   :  { %p539_p10 = pnand %p537_p9, %p534_p8 }
  0x19   :  { %542 = shalt.err (!%p539_p10)
}
  0x1a   :  { %s543_s4 = scalar_lea.vmem %s36_s24, 512  ;;  %p548_p12 = scmp.lt.s32.totalorder %s36_s24, %s36_s24 }
  0x1b   :  { %p544_p11 = scmp.ne.s32.totalorder %s36_s24, %s543_s4  ;;  %p549_p13 = scmp.lt.s32.totalorder %s543_s4, %s543_s4 }
  0x1d   :  { %p550_p0 = por %p549_p13, %p548_p12 }
  0x1f   :  { %p551_p1 = pnand %p550_p0, %p544_p11 }
  0x21   :  { %554 = shalt.err (!%p551_p1)
}
  0x22   :  { %41 = dma.hbm_to_vmem [thread:$0]  %s798_s1, 512, %s36_s24, [#allocation6], %s584_s19, %s584_s19, %s585_s20  }
  0x23   :  { %577 = dma.done.wait [#allocation3], 512  }
  0x24   :  { %578 = vsyncadd [#allocation3], 4294966784 }
  0x25   :  { %579 = dma.done.wait [#allocation6], 512  }
  0x26   :  { %580 = vsyncadd [#allocation6], 4294966784  ;;  %v249_v0 = vlaneseq  ;;  %v240_v10 = vld [vmem:[#allocation2] sm:$0xff]  ;;  %v241_v12 = vld [vmem:[#allocation2 + $0x8] sm:$0xff]  ;;  %v587_v61 = vmov 0.0   ;;  %s588_s1 = smov [#allocation7]  }
  0x27   :  { %v242_v13 = vld [vmem:[#allocation2 + $0x10] sm:$0xff]  ;;  %v243_v16 = vld [vmem:[#allocation2 + $0x18] sm:$0xff]  ;;  %v244_v32 = vld [vmem:[#allocation5] sm:$0xff]  ;;  %s464_s6 = sshll.u32 %s588_s1, 4  ;;  %s465_s6 = int_to_ptr.vmem [resolvable:$true] %s464_s6 }
  0x28   :  { %v250_v1 = vshrl.u32 %v249_v0, 7  ;;  %v255_v2 = vand.u32 127, %v249_v0  ;;  %v245_v33 = vld [vmem:[#allocation5 + $0x8] sm:$0xff]  ;;  %v246_v36 = vld [vmem:[#allocation5 + $0x10] sm:$0xff]  ;;  %v247_v39 = vld [vmem:[#allocation5 + $0x18] sm:$0xff]  ;;  %s555_s7 = scalar_lea.vmem %s465_s6, 640  ;;  %p560_p3 = scmp.lt.s32.totalorder %s465_s6, %s465_s6 }
  0x29   :  { %p556_p2 = scmp.ne.s32.totalorder %s465_s6, %s555_s7  ;;  %p561_p4 = scmp.lt.s32.totalorder %s555_s7, %s555_s7 }
  0x2a   :  { %v251_v3 = vadd.s32 8, %v250_v1  ;;  %v252_v4 = vadd.s32 16, %v250_v1  ;;  %v253_v5 = vadd.s32 24, %v250_v1  ;;  %v256_v6 = vmul.u32 128, %v250_v1 }
  0x2b   :  { %p562_p5 = por %p561_p4, %p560_p3 }
  0x2c   :  { %v257_v7 = vmul.u32 128, %v251_v3  ;;  %v258_v8 = vmul.u32 128, %v252_v4  ;;  %v634_v9 = vadd.s32 %v256_v6, %v255_v2 }
  0x2d   :  { %v259_v11 = vmul.u32 128, %v253_v5  ;;  %p563_p6 = pnand %p562_p5, %p556_p2 }
  0x2e   :  { %v636_v14 = vadd.s32 %v257_v7, %v255_v2  ;;  %v638_v15 = vadd.s32 %v258_v8, %v255_v2  ;;  %vm269_vm0 = vcmp.lt.s32.totalorder %v634_v9, 512 }
  0x2f   :  { %v641_v17 = vadd.s32 %v259_v11, %v255_v2  ;;  %v645_v18 = vsel %vm269_vm0, %v240_v10, 0.0  ;;  %v668_v37 = vsel %vm269_vm0, %v244_v32, 0.0  ;;  %v711_v62 = vsel %vm269_vm0, 1.0, %v587_v61 }
  0x30   :  { %vm270_vm1 = vcmp.lt.s32.totalorder %v636_v14, 512  ;;  %vm271_vm2 = vcmp.lt.s32.totalorder %v638_v15, 512  ;;  %v281_v19 = vand.u32 2147483647, %v645_v18  ;;  %v329_v53 = vmax.f32 %v645_v18, 0.0 }
  0x31   :  { %vm272_vm3 = vcmp.lt.s32.totalorder %v641_v17, 512  ;;  %v653_v20 = vsel %vm270_vm1, %v241_v12, 0.0  ;;  %v657_v21 = vsel %vm271_vm2, %v242_v13, 0.0  ;;  %v672_v38 = vsel %vm270_vm1, %v245_v33, 0.0 }
  0x32   :  { %v661_v22 = vsel %vm272_vm3, %v243_v16, 0.0  ;;  %v282_v23 = vand.u32 2147483647, %v653_v20  ;;  %v283_v24 = vand.u32 2147483647, %v657_v21  ;;  %v285_v26 = vsub.f32 0.0, %v281_v19 }
  0x33   :  { %v284_v25 = vand.u32 2147483647, %v661_v22  ;;  %v454_v40 = vadd.f32 %v672_v38, %v668_v37  ;;  %v678_v41 = vsel %vm271_vm2, %v246_v36, 0.0  ;;  %v683_v43 = vsel %vm272_vm3, %v247_v39, 0.0 }
  0x34   :  { %v286_v27 = vsub.f32 0.0, %v282_v23  ;;  %v287_v28 = vsub.f32 0.0, %v283_v24  ;;  %v289_v30 = vmul.f32 1.442695, %v285_v26  ;;  %v330_v54 = vmax.f32 %v653_v20, 0.0 }
  0x35   :  { %v288_v29 = vsub.f32 0.0, %v284_v25  ;;  %v455_v42 = vadd.f32 %v454_v40, %v678_v41  ;;  %v333_v55 = vmul.f32 %v668_v37, %v645_v18  ;;  %v334_v56 = vmul.f32 %v672_v38, %v653_v20 }
  0x36   :  { %v291_v31 = vmul.f32 1.442695, %v286_v27  ;;  %487 = vpow2.f32 %v289_v30  ;;  %v293_v34 = vmul.f32 1.442695, %v287_v28  ;;  %v331_v59 = vmax.f32 %v657_v21, 0.0 }
  0x37   :  { %v295_v35 = vmul.f32 1.442695, %v288_v29  ;;  %v456_v44 = vadd.f32 %v455_v42, %v683_v43  ;;  %v335_v60 = vmul.f32 %v678_v41, %v657_v21  ;;  %v332_v63 = vmax.f32 %v661_v22, 0.0 }
  0x38   :  { %489 = vpow2.f32 %v291_v31  ;;  %v336_v0 = vmul.f32 %v683_v43, %v661_v22  ;;  %vm317_vm4 = vcmp.ge.f32.partialorder %v645_v18, 0.0  ;;  %v337_v2 = vsub.f32 %v329_v53, %v333_v55 }
  0x39   :  { %491 = vpow2.f32 %v293_v34  ;;  %458 = vst [vmem:[#allocation7 + $0x20] sm:$0xff] %v456_v44  ;;  %vm318_vm5 = vcmp.ge.f32.partialorder %v653_v20, 0.0  ;;  %v338_v6 = vsub.f32 %v330_v54, %v334_v56  ;;  %v478_v9 = vsel %vm270_vm1, 1.0, %v587_v61 }
  0x3a   :  { %493 = vpow2.f32 %v295_v35  ;;  %vm319_vm6 = vcmp.ge.f32.partialorder %v657_v21, 0.0  ;;  %v339_v11 = vsub.f32 %v331_v59, %v335_v60  ;;  %v479_v16 = vsel %vm271_vm2, 1.0, %v587_v61 }
  0x3b   :  { %vm320_vm7 = vcmp.ge.f32.partialorder %v661_v22, 0.0  ;;  %v340_v24 = vsub.f32 %v332_v63, %v336_v0  ;;  %v480_v14 = vsel %vm272_vm3, 1.0, %v587_v61 }
  0x40   :  { %v686_v45 = vpop.eup %487 }
  0x41   :  { %v297_v47 = vadd.f32 1.0, %v686_v45  ;;  %v344_v57 = vmul.f32 -0.5, %v686_v45  ;;  %v347_v3 = vand.u32 2147483647, %v686_v45 }
  0x42   :  { %v688_v46 = vpop.eup %489 }
  0x43   :  { %v691_v48 = vpop.eup %491  ;;  %v298_v49 = vadd.f32 1.0, %v688_v46  ;;  %495 = vrcp.f32 %v297_v47  ;;  %v353_v58 = vmul.f32 -0.5, %v688_v46  ;;  %v356_v4 = vand.u32 2147483647, %v688_v46 }
  0x44   :  { %v694_v50 = vpop.eup %493  ;;  %v299_v51 = vadd.f32 1.0, %v691_v48  ;;  %v362_v1 = vmul.f32 -0.5, %v691_v48  ;;  %v345_v7 = vadd.f32 1.0, %v344_v57  ;;  %v365_v12 = vand.u32 2147483647, %v691_v48 }
  0x45   :  { %v300_v52 = vadd.f32 1.0, %v694_v50  ;;  %497 = vrcp.f32 %v298_v49  ;;  %v371_v5 = vmul.f32 -0.5, %v694_v50  ;;  %v354_v8 = vadd.f32 1.0, %v353_v58 }
  0x46   :  { %499 = vrcp.f32 %v299_v51  ;;  %v374_v13 = vand.u32 2147483647, %v694_v50  ;;  %v363_v25 = vadd.f32 1.0, %v362_v1  ;;  %vm732_vm8 = vcmp.lt.f32.partialorder %v347_v3, 0.0004427343 }
  0x47   :  { %501 = vrcp.f32 %v300_v52  ;;  %vm736_vm9 = vcmp.lt.f32.partialorder %v356_v4, 0.0004427343  ;;  %v372_v15 = vadd.f32 1.0, %v371_v5  ;;  %v346_v33 = vmul.f32 %v686_v45, %v345_v7 }
  0x48   :  { %503 = vlog2.f32 %v297_v47  ;;  %v355_v34 = vmul.f32 %v688_v46, %v354_v8  ;;  %vm742_vm10 = vcmp.lt.f32.partialorder %v365_v12, 0.0004427343  ;;  %vm746_vm11 = vcmp.lt.f32.partialorder %v374_v13, 0.0004427343 }
  0x49   :  { %505 = vlog2.f32 %v298_v49 }
  0x4a   :  { %507 = vlog2.f32 %v299_v51 }
  0x4b   :  { %509 = vlog2.f32 %v300_v52 }
  0x4d   :  { %v496_v10 = vpop.eup %495 }
  0x4e   :  { %v305_v23 = vmul.f32 %v496_v10, %v297_v47 }
  0x4f   :  { %v498_v19 = vpop.eup %497 }
  0x50   :  { %v500_v26 = vpop.eup %499  ;;  %v306_v27 = vmul.f32 %v498_v19, %v298_v49  ;;  %v309_v32 = vsub.f32 2.0, %v305_v23 }
  0x51   :  { %v502_v30 = vpop.eup %501  ;;  %v307_v31 = vmul.f32 %v500_v26, %v299_v51  ;;  %v364_v51 = vmul.f32 %v691_v48, %v363_v25 }
  0x52   :  { %v504_v17 = vpop.eup %503  ;;  %v308_v35 = vmul.f32 %v502_v30, %v300_v52  ;;  %v310_v36 = vsub.f32 2.0, %v306_v27  ;;  %v313_v47 = vmul.f32 %v496_v10, %v309_v32  ;;  %v373_v52 = vmul.f32 %v694_v50, %v372_v15 }
  0x53   :  { %v506_v42 = vpop.eup %505  ;;  %v311_v44 = vsub.f32 2.0, %v307_v31  ;;  %v343_v49 = vmul.f32 0.6931472, %v504_v17 }
  0x54   :  { %v508_v53 = vpop.eup %507  ;;  %v312_v54 = vsub.f32 2.0, %v308_v35  ;;  %v314_v55 = vmul.f32 %v498_v19, %v310_v36  ;;  %v352_v56 = vmul.f32 0.6931472, %v506_v42  ;;  %v321_v59 = vmul.f32 %v686_v45, %v313_v47 }
  0x55   :  { %v510_v57 = vpop.eup %509  ;;  %v315_v58 = vmul.f32 %v500_v26, %v311_v44  ;;  %v349_v60 = vsel %vm732_vm8, %v346_v33, %v343_v49  ;;  %v361_v61 = vmul.f32 0.6931472, %v508_v53 }
  0x56   :  { %v316_v63 = vmul.f32 %v502_v30, %v312_v54  ;;  %v322_v0 = vmul.f32 %v688_v46, %v314_v55  ;;  %v358_v1 = vsel %vm736_vm9, %v355_v34, %v352_v56  ;;  %v370_v3 = vmul.f32 0.6931472, %v510_v57 }
  0x57   :  { %v323_v4 = vmul.f32 %v691_v48, %v315_v58  ;;  %v325_v5 = vsel %vm317_vm4, %v313_v47, %v321_v59  ;;  %v367_v7 = vsel %vm742_vm10, %v364_v51, %v361_v61  ;;  %v377_v45 = vadd.f32 %v349_v60, %v337_v2 }
  0x58   :  { %v324_v8 = vmul.f32 %v694_v50, %v316_v63  ;;  %v326_v10 = vsel %vm318_vm5, %v314_v55, %v322_v0  ;;  %v376_v46 = vsel %vm746_vm11, %v373_v52, %v370_v3  ;;  %v378_v12 = vadd.f32 %v358_v1, %v338_v6 }
  0x59   :  { %v327_v13 = vsel %vm319_vm6, %v315_v58, %v323_v4  ;;  %v379_v48 = vadd.f32 %v367_v7, %v339_v11  ;;  %v380_v19 = vadd.f32 %v376_v46, %v340_v24  ;;  %v389_v18 = vmul.f32 %v711_v62, %v377_v45 }
  0x5a   :  { %v328_v23 = vsel %vm320_vm7, %v316_v63, %v324_v8  ;;  %v390_v2 = vmul.f32 %v478_v9, %v378_v12  ;;  %v393_v50 = vmul.f32 %v711_v62, %v325_v5  ;;  %v394_v25 = vmul.f32 %v478_v9, %v326_v10 }
  0x5b   :  { %v391_v20 = vmul.f32 %v479_v16, %v379_v48  ;;  %v392_v26 = vmul.f32 %v480_v14, %v380_v19  ;;  %v395_v27 = vmul.f32 %v479_v16, %v327_v13  ;;  %v396_v28 = vmul.f32 %v480_v14, %v328_v23 }
  0x5c   :  { %v397_v6 = vmul.f32 %v393_v50, %v668_v37  ;;  %v398_v21 = vmul.f32 %v394_v25, %v672_v38  ;;  %v426_v29 = vadd.f32 %v390_v2, %v389_v18  ;;  %v401_v11 = vadd.f32 %v393_v50, %v668_v37 }
  0x5d   :  { %v399_v24 = vmul.f32 %v395_v27, %v678_v41  ;;  %v400_v22 = vmul.f32 %v396_v28, %v683_v43  ;;  %v402_v15 = vadd.f32 %v394_v25, %v672_v38  ;;  %v403_v62 = vadd.f32 %v395_v27, %v678_v41 }
  0x5e   :  { %v427_v9 = vadd.f32 %v426_v29, %v391_v20  ;;  %v404_v30 = vadd.f32 %v396_v28, %v683_v43  ;;  %v405_v16 = vmul.f32 2.0, %v397_v6  ;;  %v406_v14 = vmul.f32 2.0, %v398_v21 }
  0x5f   :  { %v407_v31 = vmul.f32 2.0, %v399_v24  ;;  %v408_v32 = vmul.f32 2.0, %v400_v22  ;;  %v440_v33 = vadd.f32 %v398_v21, %v397_v6  ;;  %v447_v34 = vadd.f32 %v394_v25, %v393_v50 }
  0x60   :  { %v428_v17 = vadd.f32 %v427_v9, %v392_v26  ;;  %v409_v35 = vsub.f32 %v401_v11, %v405_v16  ;;  %v410_v37 = vsub.f32 %v402_v15, %v406_v14 }
  0x61   :  { %v411_v36 = vsub.f32 %v403_v62, %v407_v31  ;;  %v412_v39 = vsub.f32 %v404_v30, %v408_v32  ;;  %v441_v40 = vadd.f32 %v440_v33, %v399_v24  ;;  %v448_v42 = vadd.f32 %v447_v34, %v395_v27 }
  0x62   :  { %v413_v44 = vmul.f32 0.25, %v409_v35  ;;  %v414_v38 = vmul.f32 0.25, %v410_v37  ;;  %430 = vst [vmem:[#allocation7] sm:$0xff] %v428_v17 }
  0x63   :  { %v415_v47 = vmul.f32 0.25, %v411_v36  ;;  %v416_v41 = vmul.f32 0.25, %v412_v39  ;;  %v442_v49 = vadd.f32 %v441_v40, %v400_v22  ;;  %v449_v51 = vadd.f32 %v448_v42, %v396_v28 }
  0x64   :  { %v417_v43 = vmul.f32 %v413_v44, %v409_v35  ;;  %v418_v53 = vmul.f32 %v414_v38, %v410_v37 }
  0x65   :  { %v419_v54 = vmul.f32 %v415_v47, %v411_v36  ;;  %v420_v55 = vmul.f32 %v416_v41, %v412_v39  ;;  %444 = vst [vmem:[#allocation7 + $0x10] sm:$0xff] %v442_v49  ;;  %451 = vst [vmem:[#allocation7 + $0x18] sm:$0xff] %v449_v51 }
  0x66   :  { %v421_v56 = vmul.f32 %v417_v43, %v389_v18  ;;  %v422_v52 = vmul.f32 %v418_v53, %v390_v2 }
  0x67   :  { %v423_v57 = vmul.f32 %v419_v54, %v391_v20  ;;  %v424_v58 = vmul.f32 %v420_v55, %v392_v26 }
  0x68   :  { %v433_v59 = vadd.f32 %v422_v52, %v421_v56 }
  0x6a   :  { %v434_v60 = vadd.f32 %v433_v59, %v423_v57 }
  0x6c   :  { %v435_v61 = vadd.f32 %v434_v60, %v424_v58 }
  0x6e   :  { %437 = vst [vmem:[#allocation7 + $0x8] sm:$0xff] %v435_v61 }
  0x6f   :  { %566 = shalt.err (!%p563_p6)
}
  0x70   :  { %s567_s10 = scalar_lea.hbm %s799_s2, 640 }
  0x71   :  { %p568_p7 = scmp.ne.s32.totalorder %s799_s2, %s567_s10  ;;  %p571_p8 = scmp.lt.u32.totalorder %s567_s10, %s799_s2 }
  0x73   :  { %p573_p9 = pnand %p571_p8, %p568_p7 }
  0x75   :  { %576 = shalt.err (!%p573_p9)
}
  0x76   :  { %470 = dma.vmem_to_hbm [thread:$0]  %s465_s6, 640, %s799_s2, [#allocation4], %s584_s19, %s584_s19, %s585_s20  }
  0x77   :  { %581 = dma.done.wait [#allocation4], 640  }
  0x78   :  { %582 = vsyncadd [#allocation4], 4294966656 }
  0x79   :  { %474 = vsyncpa [#allocation3], 1 }
  0x7a   :  { %475 = vsyncpa [#allocation6], 1 }
  0x7b   :  { %476 = vsyncpa [#allocation4], 1 }

</bundles_post_ra>
